<compile_context>
chip_gen: v7x
topology: tpu7x:2x2x1
jax: 0.10.0
libtpu: 0.0.40
codegen_flags: <defaults>
</compile_context>

<pallas_src>
import functools

import jax
import jax.numpy as jnp
from jax.experimental import pallas as pl
from jax.experimental.pallas import tpu as pltpu


# Synthetic backbone hyper-parameters (Conv2d 3x3, padding 1, stride 1).
KH, KW, PAD = 3, 3, 1
LANE = 128


# ---------------------------------------------------------------------------
# Fused Pallas kernel (per batch tile): conv(matmul)+ReLU+avgpool -> head -> classifier
# ---------------------------------------------------------------------------
def _fused_forward_kernel(patches_ref, pool_ref, wconv_ref, bconv_ref,
                          w1_ref, b1_ref, w2_ref, b2_ref,
                          y_ref, f_ref):
    # Conv as ONE matmul over the whole batch tile:
    #   (B_tile*HW, K) @ (K, Cout), bf16 operands, f32 accumulation on the MXU.
    conv = jnp.dot(patches_ref[0], wconv_ref[...],
                   preferred_element_type=jnp.float32)
    conv = jnp.maximum(conv + bconv_ref[...], 0.0)            # bias + ReLU, f32 on the VPU

    # Global average pool via a hoisted block-diagonal (1/HW) pooling matrix:
    #   (B_tile, B_tile*HW) @ (B_tile*HW, Cout) -> (B_tile, Cout), bf16 x bf16, f32 acc.
    feat = jnp.dot(pool_ref[...], conv.astype(jnp.bfloat16),
                   preferred_element_type=jnp.float32)

    # MLP head (output lane-padded to 128 so the store is a full-lane block).
    h = jnp.dot(feat.astype(jnp.bfloat16), w1_ref[...],
                preferred_element_type=jnp.float32) + b1_ref[...]
    h = jnp.maximum(h, 0.0)                                   # padded cols stay exactly 0
    f_ref[0] = h                                              # returned feature = head output

    # Classifier (padded rows/cols of w2 are zero -> padded output cols are exactly 0).
    y_ref[0] = jnp.dot(h.astype(jnp.bfloat16), w2_ref[...],
                       preferred_element_type=jnp.float32) + b2_ref[...]


# ---------------------------------------------------------------------------
# One-time parameter preparation (layout, transpose, lane-padding, bf16) — outside jit
# ---------------------------------------------------------------------------
def prepare_params(params):
    conv_w = params["conv_w"]      # (Cout, Cin, KH, KW)  -- PyTorch layout
    conv_b = params["conv_b"]      # (Cout,)
    head_w = params["head_w"]      # (hidden, fdim)       -- PyTorch Linear layout
    head_b = params["head_b"]      # (hidden,)
    cls_w = params["cls_w"]        # (num_classes, hidden)
    cls_b = params["cls_b"]        # (num_classes,)

    cout, cin, kh, kw = conv_w.shape
    k = kh * kw * cin
    hidden, fdim = head_w.shape
    num_classes = cls_w.shape[0]
    assert hidden <= LANE and num_classes <= LANE

    # (Cout, Cin, KH, KW) -> (K, Cout) in (kh, kw, cin) order matching the wrapper im2col.
    # NOTE: no K padding — kept at K=36; Mosaic pads the lane dim in VMEM for free.
    w_mat = jnp.transpose(conv_w, (2, 3, 1, 0)).reshape(k, cout).astype(jnp.bfloat16)

    # Head/classifier weights zero-padded to 128 output lanes -> lane-dense output stores.
    w1 = jnp.zeros((fdim, LANE), jnp.bfloat16).at[:, :hidden].set(
        jnp.transpose(head_w).astype(jnp.bfloat16))
    b1 = jnp.zeros((1, LANE), jnp.float32).at[:, :hidden].set(
        head_b[None, :].astype(jnp.float32))
    w2 = jnp.zeros((LANE, LANE), jnp.bfloat16).at[:hidden, :num_classes].set(
        jnp.transpose(cls_w).astype(jnp.bfloat16))
    b2 = jnp.zeros((1, LANE), jnp.float32).at[:, :num_classes].set(
        cls_b[None, :].astype(jnp.float32))

    prep = {
        "wconv": w_mat,                                        # (K, Cout) bf16
        "bconv": conv_b.reshape(1, cout).astype(jnp.float32),  # (1, Cout) f32
        "w1": w1, "b1": b1,                                    # (fdim, 128) bf16 / (1, 128) f32
        "w2": w2, "b2": b2,                                    # (128, 128) bf16 / (1, 128) f32
    }
    dims = {"hidden": hidden, "num_classes": num_classes}      # static ints for final slicing
    return prep, dims


def _pick_batch_tile(batch, max_tile=8):
    """Batch-tile heuristic: keep >=2 parallel grid steps when B>=2 (v7x megacore),
    cap the tile so double-buffered patches stay tiny in VMEM (64 MiB on v7x)."""
    if batch <= 1:
        return max(batch, 1)
    tile = min(max_tile, max(1, batch // 2))
    while batch % tile:
        tile -= 1
    return tile


# ---------------------------------------------------------------------------
# Forward wrapper (glue: layout conversion + im2col + single fused pallas_call)
# ---------------------------------------------------------------------------
def simple_net_sg_forward(x_nchw, prep, *, dims, label=None, return_feature=False):
    # TODO(synk): `label` ignored (only used by style-generation backbones upstream).
    del label
    wconv, bconv = prep["wconv"], prep["bconv"]
    w1, b1, w2, b2 = prep["w1"], prep["b1"], prep["w2"], prep["b2"]
    hidden, num_classes = dims["hidden"], dims["num_classes"]

    B, Cin, H, W = x_nchw.shape
    K, Cout = wconv.shape
    fdim = w1.shape[0]
    HW = H * W
    b_tile = _pick_batch_tile(B)
    n_tiles = B // b_tile
    m_tile = b_tile * HW

    # NCHW -> NHWC, pad, im2col with (kh, kw, cin) ordering; batch-blocked to
    # (n_tiles, B_tile*HW, K) so each grid step gets one big lane-friendly matmul operand.
    x_nhwc = jnp.transpose(x_nchw, (0, 2, 3, 1))
    x_pad = jnp.pad(x_nhwc, ((0, 0), (PAD, PAD), (PAD, PAD), (0, 0)))
    patches = jnp.stack(
        [x_pad[:, dh:dh + H, dw:dw + W, :] for dh in range(KH) for dw in range(KW)],
        axis=3,
    ).reshape(n_tiles, m_tile, KH * KW * Cin).astype(jnp.bfloat16)

    # Block-diagonal mean-pool matrix (1/HW per image), hoisted out of the kernel;
    # it is a compile-time constant under jit.
    img = jnp.arange(b_tile, dtype=jnp.int32)[:, None]
    col = jnp.arange(m_tile, dtype=jnp.int32)[None, :]
    pool = jnp.where(col // HW == img, 1.0 / HW, 0.0).astype(jnp.bfloat16)

    y_pad, f_pad = pl.pallas_call(
        _fused_forward_kernel,
        out_shape=(
            jax.ShapeDtypeStruct((n_tiles, b_tile, LANE), jnp.float32),
            jax.ShapeDtypeStruct((n_tiles, b_tile, LANE), jnp.float32),
        ),
        grid=(n_tiles,),
        in_specs=[
            pl.BlockSpec((1, m_tile, K), lambda t: (t, 0, 0)),   # im2col patches (per tile)
            pl.BlockSpec((b_tile, m_tile), lambda t: (0, 0)),    # pooling matrix
            pl.BlockSpec((K, Cout), lambda t: (0, 0)),           # conv weight
            pl.BlockSpec((1, Cout), lambda t: (0, 0)),           # conv bias
            pl.BlockSpec((fdim, LANE), lambda t: (0, 0)),        # head weight (lane-padded)
            pl.BlockSpec((1, LANE), lambda t: (0, 0)),           # head bias
            pl.BlockSpec((LANE, LANE), lambda t: (0, 0)),        # classifier weight
            pl.BlockSpec((1, LANE), lambda t: (0, 0)),           # classifier bias
        ],
        out_specs=(
            pl.BlockSpec((1, b_tile, LANE), lambda t: (t, 0, 0)),   # logits (lane-dense)
            pl.BlockSpec((1, b_tile, LANE), lambda t: (t, 0, 0)),   # head feature (lane-dense)
        ),
        compiler_params=pltpu.CompilerParams(dimension_semantics=("parallel",)),
    )(patches, pool, wconv, bconv, w1, b1, w2, b2)

    y = y_pad.reshape(B, LANE)[:, :num_classes]
    f = f_pad.reshape(B, LANE)[:, :hidden]
    if return_feature:
        return y, f
    return y


# ---------------------------------------------------------------------------
# Pure-JAX f32 reference (same math, no Pallas) for a tolerance check
# ---------------------------------------------------------------------------
def reference_forward(x_nchw, params):
    conv_w, conv_b = params["conv_w"], params["conv_b"]
    head_w, head_b = params["head_w"], params["head_b"]
    cls_w, cls_b = params["cls_w"], params["cls_b"]
    B, Cin, H, W = x_nchw.shape
    cout = conv_w.shape[0]
    x_nhwc = jnp.transpose(x_nchw, (0, 2, 3, 1))
    x_pad = jnp.pad(x_nhwc, ((0, 0), (PAD, PAD), (PAD, PAD), (0, 0)))
    patches = jnp.stack(
        [x_pad[:, dh:dh + H, dw:dw + W, :] for dh in range(KH) for dw in range(KW)],
        axis=3,
    ).reshape(B, H * W, KH * KW * Cin)
    w_mat = jnp.transpose(conv_w, (2, 3, 1, 0)).reshape(KH * KW * Cin, cout)
    conv = jnp.maximum(patches @ w_mat + conv_b[None, None, :], 0.0)
    feat = conv.mean(axis=1)
    h = jnp.maximum(feat @ head_w.T + head_b[None, :], 0.0)
    y = h @ cls_w.T + cls_b[None, :]
    return y, h


# ---------------------------------------------------------------------------
# Deterministic parameter initialization + demo run
# ---------------------------------------------------------------------------
def init_params(key, *, cin=4, cout=32, kh=3, kw=3, hidden=32, num_classes=10):
    ks = jax.random.split(key, 6)
    scale = 0.1
    return {
        "conv_w": scale * jax.random.normal(ks[0], (cout, cin, kh, kw), jnp.float32),
        "conv_b": scale * jax.random.normal(ks[1], (cout,), jnp.float32),
        "head_w": scale * jax.random.normal(ks[2], (hidden, cout), jnp.float32),
        "head_b": scale * jax.random.normal(ks[3], (hidden,), jnp.float32),
        "cls_w": scale * jax.random.normal(ks[4], (num_classes, hidden), jnp.float32),
        "cls_b": scale * jax.random.normal(ks[5], (num_classes,), jnp.float32),
    }


if __name__ == "__main__":
    key = jax.random.PRNGKey(0)
    k_x, k_p = jax.random.split(key)

    # Small shapes consistent with the module: batch=2, channels=4, spatial=16.
    x = jax.random.normal(k_x, (2, 4, 16, 16), jnp.float32)   # NCHW input
    params = init_params(k_p)
    prep, dims = prepare_params(params)                        # one-time layout/dtype prep

    fwd = jax.jit(functools.partial(simple_net_sg_forward, dims=dims, return_feature=True))
    y, f = fwd(x, prep)
    jax.block_until_ready(y)
    jax.block_until_ready(f)

    assert y.shape == (2, 10) and f.shape == (2, 32)
    assert bool(jnp.isfinite(y).all()) and bool(jnp.isfinite(f).all())

    # Loose tolerance: bf16 matmul operands with f32 accumulation drift ~1e-3 here.
    y_ref, f_ref = reference_forward(x, params)
    assert bool(jnp.allclose(y, y_ref, atol=5e-2, rtol=5e-2))
    assert bool(jnp.allclose(f, f_ref, atol=5e-2, rtol=5e-2))
    print("KERNEL_OK")
</pallas_src>

<mosaic_0001>
module attributes {stable_mosaic.version = 11 : i64} {
  func.func @_fused_forward_kernel(%arg0: i32, %arg1: memref<1x256x36xbf16, #tpu.memory_space<vmem>>, %arg2: memref<1x256xbf16, #tpu.memory_space<vmem>>, %arg3: memref<36x32xbf16, #tpu.memory_space<vmem>>, %arg4: memref<1x32xf32, #tpu.memory_space<vmem>>, %arg5: memref<32x128xbf16, #tpu.memory_space<vmem>>, %arg6: memref<1x128xf32, #tpu.memory_space<vmem>>, %arg7: memref<128x128xbf16, #tpu.memory_space<vmem>>, %arg8: memref<1x128xf32, #tpu.memory_space<vmem>>, %arg9: memref<1x1x128xf32, #tpu.memory_space<vmem>>, %arg10: memref<1x1x128xf32, #tpu.memory_space<vmem>>) attributes {dimension_semantics = [#tpu.dimension_semantics<parallel>], iteration_bounds = array<i64: 2>, scalar_prefetch = 0 : i64, scratch_operands = 0 : i64, tpu.core_type = #tpu.core_type<tc>, window_params = [{transform_indices = @transform_0, window_bounds = array<i64: 1, 256, 36>}, {pipeline_mode = #tpu.pipeline_mode<synchronous>, transform_indices = @transform_1, window_bounds = array<i64: 1, 256>}, {pipeline_mode = #tpu.pipeline_mode<synchronous>, transform_indices = @transform_2, window_bounds = array<i64: 36, 32>}, {pipeline_mode = #tpu.pipeline_mode<synchronous>, transform_indices = @transform_3, window_bounds = array<i64: 1, 32>}, {pipeline_mode = #tpu.pipeline_mode<synchronous>, transform_indices = @transform_4, window_bounds = array<i64: 32, 128>}, {pipeline_mode = #tpu.pipeline_mode<synchronous>, transform_indices = @transform_5, window_bounds = array<i64: 1, 128>}, {pipeline_mode = #tpu.pipeline_mode<synchronous>, transform_indices = @transform_6, window_bounds = array<i64: 128, 128>}, {pipeline_mode = #tpu.pipeline_mode<synchronous>, transform_indices = @transform_7, window_bounds = array<i64: 1, 128>}, {transform_indices = @transform_8, window_bounds = array<i64: 1, 1, 128>}, {transform_indices = @transform_9, window_bounds = array<i64: 1, 1, 128>}]} {
    %c0 = arith.constant 0 : index
    %c0_0 = arith.constant 0 : index
    %c0_1 = arith.constant 0 : index
    %0 = vector.load %arg1[%c0, %c0_0, %c0_1] : memref<1x256x36xbf16, #tpu.memory_space<vmem>>, vector<1x256x36xbf16>
    %1 = vector.shape_cast %0 : vector<1x256x36xbf16> to vector<256x36xbf16>
    %c0_2 = arith.constant 0 : index
    %c0_3 = arith.constant 0 : index
    %2 = vector.load %arg3[%c0_2, %c0_3] : memref<36x32xbf16, #tpu.memory_space<vmem>>, vector<36x32xbf16>
    %cst = arith.constant dense<0.000000e+00> : vector<256x32xf32>
    %3 = tpu.matmul %1, %2, %cst {dimension_numbers = #tpu.dot_dimension_numbers<[1], [0], [0], [1], [0, 0, 1, 1], [], []>} : vector<256x36xbf16>, vector<36x32xbf16>, vector<256x32xf32> -> vector<256x32xf32>
    %c0_4 = arith.constant 0 : index
    %c0_5 = arith.constant 0 : index
    %4 = vector.load %arg4[%c0_4, %c0_5] : memref<1x32xf32, #tpu.memory_space<vmem>>, vector<1x32xf32>
    %5 = vector.broadcast %4 : vector<1x32xf32> to vector<256x32xf32>
    %6 = arith.addf %3, %5 : vector<256x32xf32>
    %cst_6 = arith.constant 0.000000e+00 : f32
    %7 = vector.broadcast %cst_6 : f32 to vector<256x32xf32>
    %8 = arith.maximumf %6, %7 : vector<256x32xf32>
    %c0_7 = arith.constant 0 : index
    %c0_8 = arith.constant 0 : index
    %9 = vector.load %arg2[%c0_7, %c0_8] : memref<1x256xbf16, #tpu.memory_space<vmem>>, vector<1x256xbf16>
    %10 = arith.truncf %8 : vector<256x32xf32> to vector<256x32xbf16>
    %cst_9 = arith.constant dense<0.000000e+00> : vector<1x32xf32>
    %11 = tpu.matmul %9, %10, %cst_9 {dimension_numbers = #tpu.dot_dimension_numbers<[1], [0], [0], [1], [0, 0, 1, 1], [], []>} : vector<1x256xbf16>, vector<256x32xbf16>, vector<1x32xf32> -> vector<1x32xf32>
    %12 = arith.truncf %11 : vector<1x32xf32> to vector<1x32xbf16>
    %c0_10 = arith.constant 0 : index
    %c0_11 = arith.constant 0 : index
    %13 = vector.load %arg5[%c0_10, %c0_11] : memref<32x128xbf16, #tpu.memory_space<vmem>>, vector<32x128xbf16>
    %cst_12 = arith.constant dense<0.000000e+00> : vector<1x128xf32>
    %14 = tpu.matmul %12, %13, %cst_12 {dimension_numbers = #tpu.dot_dimension_numbers<[1], [0], [0], [1], [0, 0, 1, 1], [], []>} : vector<1x32xbf16>, vector<32x128xbf16>, vector<1x128xf32> -> vector<1x128xf32>
    %c0_13 = arith.constant 0 : index
    %c0_14 = arith.constant 0 : index
    %15 = vector.load %arg6[%c0_13, %c0_14] : memref<1x128xf32, #tpu.memory_space<vmem>>, vector<1x128xf32>
    %16 = arith.addf %14, %15 : vector<1x128xf32>
    %cst_15 = arith.constant 0.000000e+00 : f32
    %17 = vector.broadcast %cst_15 : f32 to vector<1x128xf32>
    %18 = arith.maximumf %16, %17 : vector<1x128xf32>
    %c0_16 = arith.constant 0 : index
    %c0_17 = arith.constant 0 : index
    %c0_18 = arith.constant 0 : index
    %19 = vector.load %arg10[%c0_16, %c0_17, %c0_18] : memref<1x1x128xf32, #tpu.memory_space<vmem>>, vector<1x1x128xf32>
    %20 = vector.shape_cast %19 : vector<1x1x128xf32> to vector<1x128xf32>
    %21 = vector.shape_cast %18 : vector<1x128xf32> to vector<1x1x128xf32>
    tpu.vector_store %arg10[%c0_16, %c0_17, %c0_18], %21 {strides = array<i32>} : memref<1x1x128xf32, #tpu.memory_space<vmem>>, vector<1x1x128xf32>,
    %22 = arith.truncf %18 : vector<1x128xf32> to vector<1x128xbf16>
    %c0_19 = arith.constant 0 : index
    %c0_20 = arith.constant 0 : index
    %23 = vector.load %arg7[%c0_19, %c0_20] : memref<128x128xbf16, #tpu.memory_space<vmem>>, vector<128x128xbf16>
    %cst_21 = arith.constant dense<0.000000e+00> : vector<1x128xf32>
    %24 = tpu.matmul %22, %23, %cst_21 {dimension_numbers = #tpu.dot_dimension_numbers<[1], [0], [0], [1], [0, 0, 1, 1], [], []>} : vector<1x128xbf16>, vector<128x128xbf16>, vector<1x128xf32> -> vector<1x128xf32>
    %c0_22 = arith.constant 0 : index
    %c0_23 = arith.constant 0 : index
    %25 = vector.load %arg8[%c0_22, %c0_23] : memref<1x128xf32, #tpu.memory_space<vmem>>, vector<1x128xf32>
    %26 = arith.addf %24, %25 : vector<1x128xf32>
    %c0_24 = arith.constant 0 : index
    %c0_25 = arith.constant 0 : index
    %c0_26 = arith.constant 0 : index
    %27 = vector.load %arg9[%c0_24, %c0_25, %c0_26] : memref<1x1x128xf32, #tpu.memory_space<vmem>>, vector<1x1x128xf32>
    %28 = vector.shape_cast %27 : vector<1x1x128xf32> to vector<1x128xf32>
    %29 = vector.shape_cast %26 : vector<1x128xf32> to vector<1x1x128xf32>
    tpu.vector_store %arg9[%c0_24, %c0_25, %c0_26], %29 {strides = array<i32>} : memref<1x1x128xf32, #tpu.memory_space<vmem>>, vector<1x1x128xf32>,
    return
  }
  func.func @transform_0(%arg0: i32) -> (i32, i32, i32) {
    %c0_i32 = arith.constant 0 : i32
    %c0_i32_0 = arith.constant 0 : i32
    %c0_i32_1 = arith.constant 0 : i32
    return %arg0, %c0_i32, %c0_i32_0 : i32, i32, i32
  }
  func.func @transform_1(%arg0: i32) -> (i32, i32) {
    %c0_i32 = arith.constant 0 : i32
    %c0_i32_0 = arith.constant 0 : i32
    %c0_i32_1 = arith.constant 0 : i32
    return %c0_i32, %c0_i32_0 : i32, i32
  }
  func.func @transform_2(%arg0: i32) -> (i32, i32) {
    %c0_i32 = arith.constant 0 : i32
    %c0_i32_0 = arith.constant 0 : i32
    %c0_i32_1 = arith.constant 0 : i32
    return %c0_i32, %c0_i32_0 : i32, i32
  }
  func.func @transform_3(%arg0: i32) -> (i32, i32) {
    %c0_i32 = arith.constant 0 : i32
    %c0_i32_0 = arith.constant 0 : i32
    %c0_i32_1 = arith.constant 0 : i32
    return %c0_i32, %c0_i32_0 : i32, i32
  }
  func.func @transform_4(%arg0: i32) -> (i32, i32) {
    %c0_i32 = arith.constant 0 : i32
    %c0_i32_0 = arith.constant 0 : i32
    %c0_i32_1 = arith.constant 0 : i32
    return %c0_i32, %c0_i32_0 : i32, i32
  }
  func.func @transform_5(%arg0: i32) -> (i32, i32) {
    %c0_i32 = arith.constant 0 : i32
    %c0_i32_0 = arith.constant 0 : i32
    %c0_i32_1 = arith.constant 0 : i32
    return %c0_i32, %c0_i32_0 : i32, i32
  }
  func.func @transform_6(%arg0: i32) -> (i32, i32) {
    %c0_i32 = arith.constant 0 : i32
    %c0_i32_0 = arith.constant 0 : i32
    %c0_i32_1 = arith.constant 0 : i32
    return %c0_i32, %c0_i32_0 : i32, i32
  }
  func.func @transform_7(%arg0: i32) -> (i32, i32) {
    %c0_i32 = arith.constant 0 : i32
    %c0_i32_0 = arith.constant 0 : i32
    %c0_i32_1 = arith.constant 0 : i32
    return %c0_i32, %c0_i32_0 : i32, i32
  }
  func.func @transform_8(%arg0: i32) -> (i32, i32, i32) {
    %c0_i32 = arith.constant 0 : i32
    %c0_i32_0 = arith.constant 0 : i32
    %c0_i32_1 = arith.constant 0 : i32
    return %arg0, %c0_i32, %c0_i32_0 : i32, i32, i32
  }
  func.func @transform_9(%arg0: i32) -> (i32, i32, i32) {
    %c0_i32 = arith.constant 0 : i32
    %c0_i32_0 = arith.constant 0 : i32
    %c0_i32_1 = arith.constant 0 : i32
    return %arg0, %c0_i32, %c0_i32_0 : i32, i32, i32
  }
}

</mosaic_0001>

<bundles_post_ra>
// kernel: simple_net_sg_forward.1
= control target key start
LH: loop header
LB: loop body
LE: loop exit
PB: predicated region body
PF: predicated region fallthrough
CT: control target
= control target key end

     0   :  { %15 = vsyncpa [#allocation3], 0  ;;  %s1785_s0 = inlined_call_operand.vmem [shape: bf16[2,256,36], index: 0, kind: input, shape index: {}]   ;;  %s1786_s1 = inlined_call_operand.vmem [shape: bf16[1,256], index: 1, kind: input, shape index: {}]   ;;  %s1787_s2 = inlined_call_operand.vmem [shape: bf16[36,32], index: 2, kind: input, shape index: {}]   ;;  %s1788_s3 = inlined_call_operand.vmem [shape: f32[1,32], index: 3, kind: input, shape index: {}]   ;;  %s1789_s4 = inlined_call_operand.vmem [shape: bf16[32,128], index: 4, kind: input, shape index: {}]   ;;  %s1790_s5 = inlined_call_operand.vmem [shape: f32[1,128], index: 5, kind: input, shape index: {}]   ;;  %s1791_s6 = inlined_call_operand.vmem [shape: bf16[128,128], index: 6, kind: input, shape index: {}]   ;;  %s1792_s7 = inlined_call_operand.vmem [shape: f32[1,128], index: 7, kind: input, shape index: {}]   ;;  %s1793_s8 = inlined_call_operand.hbm [shape: f32[2,1,128], index: 8, kind: output, shape index: {0}]   ;;  %s1794_s9 = inlined_call_operand.hbm [shape: f32[2,1,128], index: 9, kind: output, shape index: {1}]  }
   0x1   :  { %17 = vsyncpa [#allocation3 + $0x1], 0 }
   0x2   :  { %18 = vsyncpa [#allocation5], 0 }
   0x3   :  { %20 = vsyncpa [#allocation5 + $0x1], 0  ;;  %s1498_s30 = smov 0   ;;  %s1500_s10 = smov 0  }
   0x4   :  { %s1502_s11 = smov 0   ;;  %s1504_s12 = smov 0  }
   0x5 LB: > { %s1519_s13 = sadd.s32 4294967295, %s1441_s12   ;;  %s1092_s14 = sadd.s32 4294967294, %s1441_s12   ;;  %s1441_s12 = sphi %s1504_s12, %s1802_s12   ;;  %s1437_s11 = sphi %s1502_s11, %s1801_s11   ;;  %s1433_s10 = sphi %s1500_s10, %s1800_s10   ;;  %s1429_s30 = sphi %s1498_s30, %s1799_s30  }
   0x6   : > { %s1523_s15 = sadd.s32 1, %s1441_s12   ;;  %s206_s16 = sadd.s32 1, %s1437_s11 }
   0x7   : > { %s203_s17 = ssub.s32 %s1441_s12, %s1523_s15  ;;  %p216_p0 = scmp.ne.s32.totalorder %s1437_s11, %s1433_s10 }
   0x8   : > { %p204_p1 = scmp.eq.s32.totalorder %s203_s17, 0  ;;  %p217_p2 = scmp.eq.s32.totalorder %s1519_s13, 1 }
   0x9   : > { %p222_p3 = scmp.ne.s32.totalorder %s1433_s10, %s1429_s30  ;;  %p223_p4 = scmp.eq.s32.totalorder %s1092_s14, 1 }
   0xa   : > { %s1534_s18 = scalar_select %p204_p1, %s1437_s11, %s206_s16  }
   0xb   : > { %p1536_p5 = por %p217_p2, %p216_p0  ;;  %p1540_p6 = por %p223_p4, %p222_p3 }
   0xc   : > { %p1095_p7 = scmp.ge.s32.totalorder %s1441_s12, 1  ;;  %p296_p8 = scmp.lt.s32.totalorder %s1441_s12, 3 }
   0xe   : > { %p297_p9 = pnand %p1095_p7, %p296_p8 }
   0xf   : > { %v1318_v0 = vld [vmem:[%s1787_s2] sm:$0xff] (!%p297_p9)   ;;  %v1319_v1 = vld [vmem:[%s1787_s2 + $0x8] sm:$0xff] (!%p297_p9)   ;;  %p335_p10 = scmp.lt.s32.totalorder (!%p297_p9), %s1519_s13, 1  ;;  %v1320_v2 = vld [vmem:[%s1787_s2 + $0x10] ss:$0 sps:$4 sm:$0x33] (!%p297_p9)   ;;  %v755_v22 = vlaneseq (!%p297_p9) }
  0x10   : > { %300 = sbr.rel (%p297_p9) target bundleno = 977 (0x3d1), region = 52  ;;  %1204 = vmatprep.subr.bf16.mxu0 (!%p297_p9), %v1318_v0  ;;  %vm529_vm0 = vcmask (!%p297_p9), 1041408   ;;  %vm480_vm1 = vcmask (!%p297_p9), 293888   ;;  %v1443_v20 = vmov (!%p297_p9), 1966171168   ;;  %vm1445_vm2 = vmmov (!%p297_p9), 0  }
  0x11   : > { %1205 = vmatpush3.bf16.msra.mxu0 (!%p297_p9), %v1318_v0  ;;  %v531_v4 = vsel (!%p297_p9), %vm529_vm0, %v1320_v2, 0  ;;  %v753_v21 = vunpack.c.l.s4 (!%p297_p9), %v1443_v20  ;;  %v756_v24 = vshrl.u32 (!%p297_p9), %v755_v22, 7  ;;  %v1597_v25 = vld.sshfl [vmem:[%s1786_s1] sm:$0x11 pattern:$0x75316420] (!%p297_p9) }
  0x12   : > { %1206 = vmatprep.subr.bf16.mxu0 (!%p297_p9), %v1319_v1  ;;  %v751_v26 = vcombine.high (!%p297_p9), %v1597_v25, %v1597_v25  ;;  %v1609_v30 = vld [vmem:[%s1788_s3] ss:$0 sm:$0xff] (!%p297_p9)  ;;  %vm826_vm3 = vcmask (!%p297_p9), 261120   ;;  %s1704_s22 = sand.u32 (!%p297_p9), 1, %s1433_s10   ;;  %s1795_s24 = sshll.u32 (!%p297_p9), %s1519_s13, 4 }
  0x13   : > { %v754_v23 = vunpack.c.0.s8 (!%p297_p9), %v753_v21  ;;  %s334_s23 = scalar_lea.vmem (!%p297_p9), [#allocation4], %s1704_s22  ;;  %s984_s29 = scalar_lea.sflag (!%p297_p9), [#allocation5], %s1704_s22 }
  0x15   : > { %1207 = vmatpush3.bf16.msra.mxu0 (!%p297_p9), %v1319_v1  ;;  %v1601_v27 = vsub.s32 (!%p297_p9), %v754_v23, %v756_v24 }
  0x16   : > { %1270 = vmatprep.subr.msk.bf16.mxu0 (!%p297_p9), %vm529_vm0, %v1320_v2 }
  0x17   : > { %s336_s27 = scalar_select %p335_p10, %s1519_s13, 1  ;;  %v765_v28 = vrot.slane %v751_v26, %v1601_v27  ;;  %v758_v29 = vrot.slane %v1597_v25, %v1601_v27  ;;  %v1339_v25 = vld [vmem:[%s1791_s6] sm:$0xff]  }
  0x19   : > { %s1150_s28 = sshll.u32 %s336_s27, 7  ;;  %1209 = vmatpush3.bf16.msra.mxu0 %v531_v4  ;;  %800 = vmatprep.mubr.bf16.mxu1 %v765_v28  ;;  %s1713_s27 = scalar_lea.hbm %s1794_s9, %s1795_s24 }
  0x1a   : > { %s1560_s16 = scalar_lea.vmem %s1785_s0, %s1150_s28  ;;  %s1009_s28 = sshll.u32 %s334_s23, 4  ;;  %s1010_s28 = int_to_ptr.vmem [resolvable:$true] %s1009_s28 }
  0x1b   : > { %v1321_v3 = vld [vmem:[%s1560_s16] sm:$0xff]   ;;  %v1322_v5 = vld [vmem:[%s1560_s16 + $0x8] sm:$0xff]   ;;  %v1323_v6 = vld [vmem:[%s1560_s16 + $0x10] sm:$0xff]   ;;  %s1347_s14 = scalar_lea.vmem %s1010_s28, 16 }
  0x1c   : > { %1210 = vmatprep.mubr.msk.bf16.mxu0 %vm480_vm1, %v1321_v3  ;;  %v1324_v7 = vld [vmem:[%s1560_s16 + $0x18] sm:$0xff]   ;;  %v1325_v8 = vld [vmem:[%s1560_s16 + $0x20] sm:$0xff]   ;;  %v1326_v9 = vld [vmem:[%s1560_s16 + $0x28] sm:$0xff]   ;;  %p1348_p11 = scmp.ne.s32.totalorder %s1010_s28, %s1347_s14 }
  0x1d   : > { %1211 = vmatmul.mubr.msk.bf16.vlgmr.msra.gmra.mrb[0].mxu0 %vm480_vm1, %v1322_v5  ;;  %v1327_v10 = vld [vmem:[%s1560_s16 + $0x30] sm:$0xff]   ;;  %v1328_v11 = vld [vmem:[%s1560_s16 + $0x38] sm:$0xff]   ;;  %v1329_v12 = vld [vmem:[%s1560_s16 + $0x40] sm:$0xff]  }
  0x1e   : > { %1214 = vmatprep.mubr.msk.bf16.mxu0 %vm480_vm1, %v1323_v6  ;;  %v1330_v13 = vld [vmem:[%s1560_s16 + $0x48] sm:$0xff]   ;;  %v1331_v14 = vld [vmem:[%s1560_s16 + $0x50] sm:$0xff]   ;;  %v1332_v15 = vld [vmem:[%s1560_s16 + $0x58] sm:$0xff]   ;;  %p1349_p12 = pnand %p1348_p11, %p1536_p5 }
  0x1f   : > { %v1333_v16 = vld [vmem:[%s1560_s16 + $0x60] sm:$0xff]   ;;  %v1334_v17 = vld [vmem:[%s1560_s16 + $0x68] sm:$0xff]   ;;  %v1335_v18 = vld [vmem:[%s1560_s16 + $0x70] sm:$0xff]  }
  0x20   : > { %v1336_v19 = vld [vmem:[%s1560_s16 + $0x78] sm:$0xff]   ;;  %p1350_p13 = pneg %p1349_p12  ;;  %s1446_s16 = smov [#allocation4]  }
  0x21   : > { %s1351_s17 = sshll.u32 %s1446_s16, 4  ;;  %s1352_s17 = int_to_ptr.vmem [resolvable:$false] %s1351_s17 }
  0x22   : > { %s1353_s21 = scalar_lea.vmem %s1352_s17, 32  ;;  %p1354_p0 = scmp.lt.s32.totalorder %s1010_s28, %s1352_s17 }
  0x23   : > { %p1355_p1 = scmp.lt.s32.totalorder %s1353_s21, %s1347_s14 }
  0x25   : > { %1215 = vmatmul.mubr.msk.bf16.gmra.mrb[4].mxu0 %vm480_vm1, %v1324_v7  ;;  %p1356_p2 = por %p1355_p1, %p1354_p0 }
  0x26   : > { %1218 = vmatprep.mubr.msk.bf16.mxu0 %vm480_vm1, %v1325_v8 }
  0x27   : > { %p1357_p3 = pnand %p1356_p2, %p1350_p13 }
  0x2d   : > { %1219 = vmatmul.mubr.msk.bf16.gmra.mrb[8].mxu0 %vm480_vm1, %v1326_v9 }
  0x2e   : > { %1222 = vmatprep.mubr.msk.bf16.mxu0 %vm480_vm1, %v1327_v10 }
  0x35   : > { %1223 = vmatmul.mubr.msk.bf16.gmra.mrb[12].mxu0 %vm480_vm1, %v1328_v11 }
  0x36   : > { %1226 = vmatprep.mubr.msk.bf16.mxu0 %vm480_vm1, %v1329_v12 }
  0x3d   : > { %1227 = vmatmul.mubr.msk.bf16.gmra.mrb[16].mxu0 %vm480_vm1, %v1330_v13 }
  0x3e   : > { %1230 = vmatprep.mubr.msk.bf16.mxu0 %vm480_vm1, %v1331_v14 }
  0x45   : > { %1231 = vmatmul.mubr.msk.bf16.gmra.mrb[20].mxu0 %vm480_vm1, %v1332_v15 }
  0x46   : > { %1234 = vmatprep.mubr.msk.bf16.mxu0 %vm480_vm1, %v1333_v16 }
  0x4d   : > { %1235 = vmatmul.mubr.msk.bf16.gmra.mrb[24].mxu0 %vm480_vm1, %v1334_v17 }
  0x4e   : > { %1238 = vmatprep.mubr.msk.bf16.mxu0 %vm480_vm1, %v1335_v18 }
  0x55   : > { %1239 = vmatmul.mubr.msk.bf16.gmra.mrb[28].mxu0 %vm480_vm1, %v1336_v19 }
  0xf0   : > { %v1212_v31 = vpop.f32.mrb[0].mxu0 }
  0xf1   : > { %v576_v32 = vadd.f32 %v1212_v31, %v1609_v30  ;;  %v567_v33 = vpop.f32.mrb[1].mxu0 }
  0xf2   : > { %v568_v34 = vadd.f32 %v1609_v30, %v567_v33  ;;  %v1213_v35 = vpop.f32.mrb[2].mxu0 }
  0xf3   : > { %v579_v36 = vadd.f32 %v1213_v35, %v1609_v30  ;;  %v570_v37 = vpop.f32.mrb[3].mxu0  ;;  %v696_v39 = vmax.f32 %v576_v32, 0.0 }
  0xf4   : > { %v571_v38 = vadd.f32 %v1609_v30, %v570_v37  ;;  %v694_v41 = vmax.f32 %v568_v34, 0.0 }
  0xf5   : > { %v697_v40 = vmax.f32 %v579_v36, 0.0 }
  0xf6   : > { %v695_v42 = vmax.f32 %v571_v38, 0.0 }
  0xf7   : > { %v1615_v43 = vpack.c.bf16 %v697_v40, %v696_v39 }
  0xf8   : > { %v1216_v44 = vpop.f32.mrb[4].mxu0  ;;  %v1617_v45 = vpack.c.bf16 %v695_v42, %v694_v41 }
  0xf9   : > { %v592_v46 = vadd.f32 %v1216_v44, %v1609_v30  ;;  %v583_v47 = vpop.f32.mrb[5].mxu0 }
  0xfa   : > { %v584_v48 = vadd.f32 %v1609_v30, %v583_v47  ;;  %v1217_v49 = vpop.f32.mrb[6].mxu0 }
  0xfb   : > { %v595_v50 = vadd.f32 %v1217_v49, %v1609_v30  ;;  %v586_v51 = vpop.f32.mrb[7].mxu0  ;;  %v700_v53 = vmax.f32 %v592_v46, 0.0 }
  0xfc   : > { %v587_v52 = vadd.f32 %v1609_v30, %v586_v51  ;;  %v698_v55 = vmax.f32 %v584_v48, 0.0 }
  0xfd   : > { %v701_v54 = vmax.f32 %v595_v50, 0.0 }
  0xfe   : > { %v699_v56 = vmax.f32 %v587_v52, 0.0 }
  0xff   : > { %v1623_v57 = vpack.c.bf16 %v701_v54, %v700_v53 }
 0x100   : > { %v1625_v58 = vpack.c.bf16 %v699_v56, %v698_v55  ;;  %v1220_v59 = vpop.f32.mrb[8].mxu0 }
 0x101   : > { %v608_v60 = vadd.f32 %v1220_v59, %v1609_v30  ;;  %v599_v61 = vpop.f32.mrb[9].mxu0 }
 0x102   : > { %v600_v62 = vadd.f32 %v1609_v30, %v599_v61  ;;  %v1221_v63 = vpop.f32.mrb[10].mxu0 }
 0x103   : > { %v611_v0 = vadd.f32 %v1221_v63, %v1609_v30  ;;  %v602_v1 = vpop.f32.mrb[11].mxu0  ;;  %v704_v3 = vmax.f32 %v608_v60, 0.0 }
 0x104   : > { %v603_v2 = vadd.f32 %v1609_v30, %v602_v1  ;;  %v702_v5 = vmax.f32 %v600_v62, 0.0 }
 0x105   : > { %v705_v4 = vmax.f32 %v611_v0, 0.0 }
 0x106   : > { %v703_v6 = vmax.f32 %v603_v2, 0.0 }
 0x107   : > { %v1631_v7 = vpack.c.bf16 %v705_v4, %v704_v3 }
 0x108   : > { %v1633_v8 = vpack.c.bf16 %v703_v6, %v702_v5  ;;  %v1224_v9 = vpop.f32.mrb[12].mxu0 }
 0x109   : > { %v624_v10 = vadd.f32 %v1224_v9, %v1609_v30  ;;  %v615_v11 = vpop.f32.mrb[13].mxu0 }
 0x10a   : > { %v616_v12 = vadd.f32 %v1609_v30, %v615_v11  ;;  %v1225_v13 = vpop.f32.mrb[14].mxu0 }
 0x10b   : > { %v627_v14 = vadd.f32 %v1225_v13, %v1609_v30  ;;  %v618_v15 = vpop.f32.mrb[15].mxu0  ;;  %v708_v17 = vmax.f32 %v624_v10, 0.0 }
 0x10c   : > { %v619_v16 = vadd.f32 %v1609_v30, %v618_v15  ;;  %v706_v19 = vmax.f32 %v616_v12, 0.0 }
 0x10d   : > { %v709_v18 = vmax.f32 %v627_v14, 0.0 }
 0x10e   : > { %v707_v20 = vmax.f32 %v619_v16, 0.0 }
 0x10f   : > { %v1639_v21 = vpack.c.bf16 %v709_v18, %v708_v17 }
 0x110   : > { %v1641_v22 = vpack.c.bf16 %v707_v20, %v706_v19  ;;  %v1228_v23 = vpop.f32.mrb[16].mxu0 }
 0x111   : > { %v640_v24 = vadd.f32 %v1228_v23, %v1609_v30  ;;  %v631_v26 = vpop.f32.mrb[17].mxu0 }
 0x112   : > { %v632_v28 = vadd.f32 %v1609_v30, %v631_v26  ;;  %v1229_v31 = vpop.f32.mrb[18].mxu0 }
 0x113   : > { %v643_v32 = vadd.f32 %v1229_v31, %v1609_v30  ;;  %v634_v33 = vpop.f32.mrb[19].mxu0  ;;  %v712_v35 = vmax.f32 %v640_v24, 0.0  ;;  %v1342_v31 = vld [vmem:[%s1791_s6 + $0x18] sm:$0xff]  }
 0x114   : > { %v635_v34 = vadd.f32 %v1609_v30, %v634_v33  ;;  %v710_v37 = vmax.f32 %v632_v28, 0.0  ;;  %v1341_v28 = vld [vmem:[%s1791_s6 + $0x10] sm:$0xff]   ;;  %v1344_v33 = vld [vmem:[%s1791_s6 + $0x28] sm:$0xff]  }
 0x115   : > { %v713_v36 = vmax.f32 %v643_v32, 0.0  ;;  %v1343_v32 = vld [vmem:[%s1791_s6 + $0x20] sm:$0xff]  }
 0x116   : > { %v711_v38 = vmax.f32 %v635_v34, 0.0  ;;  %v1345_v34 = vld [vmem:[%s1791_s6 + $0x30] sm:$0xff]  }
 0x117   : > { %v736_v39 = vpack.c.bf16 %v713_v36, %v712_v35  ;;  %v1346_v35 = vld [vmem:[%s1791_s6 + $0x38] sm:$0xff]   ;;  %v813_v36 = vld [vmem:[%s1790_s5] sm:$0x1] }
 0x118   : > { %v1232_v40 = vpop.f32.mrb[20].mxu0  ;;  %v735_v41 = vpack.c.bf16 %v711_v38, %v710_v37 }
 0x119   : > { %v656_v42 = vadd.f32 %v1232_v40, %v1609_v30  ;;  %v647_v44 = vpop.f32.mrb[21].mxu0 }
 0x11a   : > { %v648_v46 = vadd.f32 %v1609_v30, %v647_v44  ;;  %v1233_v47 = vpop.f32.mrb[22].mxu0  ;;  %1170 = vmatprep.subr.bf16.mxu1 %v735_v41 }
 0x11b   : > { %v659_v48 = vadd.f32 %v1233_v47, %v1609_v30  ;;  %v650_v49 = vpop.f32.mrb[23].mxu0  ;;  %1171 = vmatpush3.bf16.msra.mxu1 %v1617_v45  ;;  %v716_v51 = vmax.f32 %v656_v42, 0.0 }
 0x11c   : > { %v651_v50 = vadd.f32 %v1609_v30, %v650_v49  ;;  %1172 = vmatprep.subr.bf16.mxu1 %v736_v39  ;;  %v714_v53 = vmax.f32 %v648_v46, 0.0 }
 0x11d   : > { %v717_v52 = vmax.f32 %v659_v48, 0.0 }
 0x11e   : > { %v715_v54 = vmax.f32 %v651_v50, 0.0 }
 0x11f   : > { %v738_v55 = vpack.c.bf16 %v717_v52, %v716_v51  ;;  %1173 = vmatpush3.bf16.msra.mxu1 %v1615_v43 }
 0x120   : > { %v737_v56 = vpack.c.bf16 %v715_v54, %v714_v53  ;;  %v1236_v59 = vpop.f32.mrb[24].mxu0 }
 0x121   : > { %v672_v60 = vadd.f32 %v1236_v59, %v1609_v30  ;;  %v663_v61 = vpop.f32.mrb[25].mxu0 }
 0x122   : > { %v664_v62 = vadd.f32 %v1609_v30, %v663_v61  ;;  %v1237_v63 = vpop.f32.mrb[26].mxu0  ;;  %1174 = vmatprep.subr.bf16.mxu1 %v737_v56 }
 0x123   : > { %v675_v45 = vadd.f32 %v1237_v63, %v1609_v30  ;;  %v666_v0 = vpop.f32.mrb[27].mxu0  ;;  %1175 = vmatpush3.bf16.msra.mxu1 %v1625_v58  ;;  %v720_v2 = vmax.f32 %v672_v60, 0.0 }
 0x124   : > { %v667_v1 = vadd.f32 %v1609_v30, %v666_v0  ;;  %1176 = vmatprep.subr.bf16.mxu1 %v738_v55  ;;  %v718_v43 = vmax.f32 %v664_v62, 0.0 }
 0x125   : > { %v721_v3 = vmax.f32 %v675_v45, 0.0 }
 0x126   : > { %v719_v4 = vmax.f32 %v667_v1, 0.0 }
 0x127   : > { %v740_v5 = vpack.c.bf16 %v721_v3, %v720_v2  ;;  %1177 = vmatpush3.bf16.msra.mxu1 %v1623_v57 }
 0x128   : > { %v739_v6 = vpack.c.bf16 %v719_v4, %v718_v43  ;;  %v1240_v9 = vpop.f32.mrb[28].mxu0 }
 0x129   : > { %v688_v10 = vadd.f32 %v1240_v9, %v1609_v30  ;;  %v679_v11 = vpop.f32.mrb[29].mxu0 }
 0x12a   : > { %v680_v12 = vadd.f32 %v1609_v30, %v679_v11  ;;  %v1241_v13 = vpop.f32.mrb[30].mxu0  ;;  %1178 = vmatprep.subr.bf16.mxu1 %v739_v6 }
 0x12b   : > { %v691_v58 = vadd.f32 %v1241_v13, %v1609_v30  ;;  %v682_v14 = vpop.f32.mrb[31].mxu0  ;;  %1179 = vmatpush3.bf16.msra.mxu1 %v1633_v8  ;;  %v724_v16 = vmax.f32 %v688_v10, 0.0  ;;  %v1337_v8 = vld [vmem:[%s1789_s4] sm:$0xff]  }
 0x12c   : > { %v683_v15 = vadd.f32 %v1609_v30, %v682_v14  ;;  %1180 = vmatprep.subr.bf16.mxu1 %v740_v5  ;;  %v722_v57 = vmax.f32 %v680_v12, 0.0  ;;  %v1444_v30 = vmov 0.0  }
 0x12d   : > { %v725_v17 = vmax.f32 %v691_v58, 0.0 }
 0x12e   : > { %v723_v18 = vmax.f32 %v683_v15, 0.0 }
 0x12f   : > { %v742_v19 = vpack.c.bf16 %v725_v17, %v724_v16  ;;  %1181 = vmatpush3.bf16.msra.mxu1 %v1631_v7  ;;  %v1338_v7 = vld [vmem:[%s1789_s4 + $0x8] sm:$0xff]  }
 0x130   : > { %v741_v20 = vpack.c.bf16 %v723_v18, %v722_v57 }
 0x132   : > { %1182 = vmatprep.subr.bf16.mxu1 %v741_v20 }
 0x133   : > { %1183 = vmatpush3.bf16.msra.mxu1 %v1641_v22 }
 0x134   : > { %1184 = vmatprep.subr.bf16.mxu1 %v742_v19 }
 0x137   : > { %1185 = vmatpush3.bf16.msra.mxu1 %v1639_v21 }
 0x138   : > { %1242 = vmatprep.subr.bf16.mxu1 %v1444_v30 }
 0x13a   : > { %801 = vmatmul.mubr.bf16.vlgmr.msra.gmra.mrb[0].mxu1 %v758_v29  ;;  %v1340_v29 = vld [vmem:[%s1791_s6 + $0x8] sm:$0xff]  }
 0x13b   : > { %1243 = vmatpush3.bf16.msra.mxu1 %v1337_v8  ;;  %1246 = vmatprep.mubr.msk.bf16.mxu1 %vm1445_vm2, %v1444_v30 }
 0x13c   : > { %1244 = vmatprep.subr.bf16.mxu1 %v1444_v30 }
 0x13f   : > { %1245 = vmatpush3.bf16.msra.mxu1 %v1338_v7 }
 0x140   : > { %1250 = vmatprep.subr.bf16.mxu1 %v1444_v30 }
 0x20d   : > { %v1186_v21 = vpop.f32.mrb[0].mxu1 }
 0x20e   : > { %v1187_v22 = vpop.f32.mrb[1].mxu1 }
 0x20f   : > { %v1188_v23 = vadd.f32 %v1187_v22, %v1186_v21  ;;  %v1189_v24 = vpop.f32.mrb[2].mxu1 }
 0x210   : > { %v1190_v26 = vpop.f32.mrb[3].mxu1 }
 0x211   : > { %v808_v27 = vpack.c.bf16 %v1188_v23, %v1188_v23 }
 0x213   : > { %1247 = vmatmul.mubr.msk.bf16.vlgmr.msra.gmra.mrb[4].mxu1 %vm826_vm3, %v808_v27 }
 0x214   : > { %1251 = vmatpush3.bf16.msra.mxu1 %v1339_v25  ;;  %1266 = vmatprep.mubr.msk.bf16.mxu1 %vm1445_vm2, %v1444_v30 }
 0x215   : > { %1252 = vmatprep.subr.bf16.mxu1 %v1444_v30 }
 0x218   : > { %1253 = vmatpush3.bf16.msra.mxu1 %v1340_v29 }
 0x219   : > { %1254 = vmatprep.subr.bf16.mxu1 %v1444_v30 }
 0x21c   : > { %1255 = vmatpush3.bf16.msra.mxu1 %v1341_v28 }
 0x21d   : > { %1256 = vmatprep.subr.bf16.mxu1 %v1444_v30 }
 0x220   : > { %1257 = vmatpush3.bf16.msra.mxu1 %v1342_v31 }
 0x221   : > { %1258 = vmatprep.subr.bf16.mxu1 %v1444_v30 }
 0x224   : > { %1259 = vmatpush3.bf16.msra.mxu1 %v1343_v32 }
 0x225   : > { %1260 = vmatprep.subr.bf16.mxu1 %v1444_v30 }
 0x228   : > { %1261 = vmatpush3.bf16.msra.mxu1 %v1344_v33 }
 0x229   : > { %1262 = vmatprep.subr.bf16.mxu1 %v1444_v30 }
 0x22c   : > { %1263 = vmatpush3.bf16.msra.mxu1 %v1345_v34 }
 0x22d   : > { %1264 = vmatprep.subr.bf16.mxu1 %v1444_v30 }
 0x230   : > { %1265 = vmatpush3.bf16.msra.mxu1 %v1346_v35 }
 0x2e6   : > { %v864_v37 = vpop.f32.mrb[4].mxu1 }
 0x2e7   : > { %v865_v38 = vadd.f32 %v864_v37, %v813_v36  ;;  %v1248_v39 = vpop.f32.mrb[5].mxu1 }
 0x2e8   : > { %v867_v40 = vpop.f32.mrb[6].mxu1 }
 0x2e9   : > { %v870_v41 = vmax.f32 %v865_v38, 0.0  ;;  %v1249_v42 = vpop.f32.mrb[7].mxu1 }
 0x2eb   : > { %871 = vst [vmem:[%s334_s23] sm:$0x1] %v870_v41  ;;  %v872_v44 = vpack.c.bf16 %v870_v41, %v870_v41 }
 0x2ed   : > { %1267 = vmatmul.mubr.bf16.vlgmr.msra.gmra.mrb[8].mxu1 %v872_v44 }
 0x2ee   : > { %1360 = shalt.err (!%p1357_p3)
}
 0x2ef   : > { %s1361_s23 = scalar_lea.hbm %s1713_s27, 16  ;;  %s1365_s16 = scalar_lea.hbm %s1794_s9, 32 }
 0x2f0   : > { %p1362_p4 = scmp.ne.s32.totalorder %s1713_s27, %s1361_s23  ;;  %p1366_p9 = scmp.lt.u32.totalorder %s1713_s27, %s1794_s9 }
 0x2f1   : > { %p1367_p10 = scmp.lt.u32.totalorder %s1365_s16, %s1361_s23  ;;  %p1369_p12 = scmp.lt.u32.totalorder %s1361_s23, %s1713_s27 }
 0x2f2   : > { %p1363_p7 = pnand %p1362_p4, %p1536_p5 }
 0x2f3   : > { %p1368_p11 = por %p1367_p10, %p1366_p9 }
 0x2f4   : > { %p1364_p8 = pneg %p1363_p7 }
 0x2f5   : > { %p1370_p13 = por %p1369_p12, %p1368_p11 }
 0x2f7   : > { %p1371_p0 = pnand %p1370_p13, %p1364_p8 }
 0x2f9   : > { %1374 = shalt.err (!%p1371_p0)
}
 0x2fa   : > { %1272 = dma.vmem_to_hbm [thread:$0]  (%p1536_p5), %s1010_s28, 16, %s1713_s27, %s984_s29   ;;  %v889_v46 = vld [vmem:[%s1792_s7] sm:$0x1] }
 0x2fb   : > { %s328_s24 = scalar_lea.vmem [#allocation2], %s1704_s22  ;;  %s1798_s23 = sshll.u32 %s1519_s13, 4 }
 0x2fc   : > { %s996_s25 = sshll.u32 %s328_s24, 4  ;;  %s1742_s17 = scalar_lea.hbm %s1793_s8, %s1798_s23  ;;  %s1744_s25 = int_to_ptr.vmem [resolvable:$true] %s996_s25 }
 0x2fd   : > { %s980_s27 = scalar_lea.sflag [#allocation3], %s1704_s22  ;;  %s1375_s28 = scalar_lea.vmem %s1744_s25, 16 }
 0x2fe   : > { %p1376_p1 = scmp.ne.s32.totalorder %s1744_s25, %s1375_s28  ;;  %s1447_s13 = smov [#allocation2]  }
 0x2ff   : > { %s1379_s29 = sshll.u32 %s1447_s13, 4  ;;  %s1380_s29 = int_to_ptr.vmem [resolvable:$false] %s1379_s29 }
 0x300   : > { %p1377_p2 = pnand %p1376_p1, %p1536_p5  ;;  %s1381_s14 = scalar_lea.vmem %s1380_s29, 32 }
 0x301   : > { %p1382_p4 = scmp.lt.s32.totalorder %s1744_s25, %s1380_s29  ;;  %p1383_p7 = scmp.lt.s32.totalorder %s1381_s14, %s1375_s28 }
 0x302   : > { %p1378_p3 = pneg %p1377_p2 }
 0x303   : > { %p1384_p8 = por %p1383_p7, %p1382_p4 }
 0x305   : > { %p1385_p9 = pnand %p1384_p8, %p1378_p3 }
 0x3c0   : > { %v972_v47 = vpop.f32.mrb[8].mxu1 }
 0x3c1   : > { %v973_v48 = vadd.f32 %v972_v47, %v889_v46  ;;  %v1268_v49 = vpop.f32.mrb[9].mxu1 }
 0x3c2   : > { %v975_v50 = vpop.f32.mrb[10].mxu1 }
 0x3c3   : > { %978 = vst [vmem:[%s328_s24] sm:$0x1] %v973_v48  ;;  %v1269_v51 = vpop.f32.mrb[11].mxu1 }
 0x3c4   : > { %1388 = shalt.err (!%p1385_p9)
}
 0x3c5   : > { %s1389_s22 = scalar_lea.hbm %s1742_s17, 16  ;;  %s1393_s23 = scalar_lea.hbm %s1793_s8, 32 }
 0x3c6   : > { %p1390_p10 = scmp.ne.s32.totalorder %s1742_s17, %s1389_s22  ;;  %p1394_p13 = scmp.lt.u32.totalorder %s1742_s17, %s1793_s8 }
 0x3c7   : > { %p1395_p0 = scmp.lt.u32.totalorder %s1393_s23, %s1389_s22  ;;  %p1397_p2 = scmp.lt.u32.totalorder %s1389_s22, %s1742_s17 }
 0x3c8   : > { %p1391_p11 = pnand %p1390_p10, %p1536_p5 }
 0x3c9   : > { %p1396_p1 = por %p1395_p0, %p1394_p13 }
 0x3ca   : > { %p1392_p12 = pneg %p1391_p11 }
 0x3cb   : > { %p1398_p3 = por %p1397_p2, %p1396_p1 }
 0x3cd   : > { %p1399_p4 = pnand %p1398_p3, %p1392_p12 }
 0x3cf   : > { %1402 = shalt.err (!%p1399_p4)
}
 0x3d0   : > { %1271 = dma.vmem_to_hbm [thread:$0]  (%p1536_p5), %s1744_s25, 16, %s1742_s17, %s980_s27  }
 0x3d1 PF: > { %p1282_p7 = scmp.ge.s32.totalorder %s1441_s12, 2  ;;  %s1021_s28 = sand.u32 1, %s1429_s30  }
 0x3d2   : > { %s1022_s13 = scalar_lea.sflag [#allocation3], %s1021_s28 }
 0x3d3   : > { %p1276_p8 = pnand %p1282_p7, %p1540_p6 }
 0x3d5   : > { %1420 = dma.done.wait (!%p1276_p8), %s1022_s13, 16  }
 0x3d6   : > { %1422 = vsyncadd (!%p1276_p8), %s1022_s13, 4294967280  ;;  %s1030_s29 = scalar_lea.sflag [#allocation5], %s1021_s28 }
 0x3d7   : > { %1424 = dma.done.wait (!%p1276_p8), %s1030_s29, 16  }
 0x3d8   : > { %1426 = vsyncadd (!%p1276_p8), %s1030_s29, 4294967280  ;;  %p23_p5 = scmp.ge.s32.totalorder %s1523_s15, 4   ;;  %s1799_s30 = smov %s1433_s10 }
 0x3d9   : > { %s1800_s10 = smov %s1437_s11  ;;  %s1801_s11 = smov %s1534_s18 }
 0x3da   : > { %s1802_s12 = smov %s1523_s15  ;;  %25 = sbr.rel (!%p23_p5) target bundleno = 5 (0x5), region = 104 }
 0x3e1   :  { %1034 = vsyncpa [#allocation3], 1 }
 0x3e2   :  { %1036 = vsyncpa [#allocation3 + $0x1], 1 }
 0x3e3   :  { %1037 = vsyncpa [#allocation5], 1 }
 0x3e4   :  { %1039 = vsyncpa [#allocation5 + $0x1], 1 }

</bundles_post_ra>
